<compile_context>
chip_gen: v6e
topology: v6e:2x2x1
jax: 0.10.0
libtpu: 0.0.40
codegen_flags: <defaults>
</compile_context>

<pallas_src>
import functools

import jax
import jax.numpy as jnp
from jax.experimental import pallas as pl
from jax.experimental.pallas import tpu as pltpu

_LANE = 128                      # TPU lane width (last-dim granularity)
_SUBLANE = 8                     # TPU sublane granularity (second-to-last dim)
_MAX_ROW_TILE = 2048             # upper bound on rows per grid step
_VMEM_SOFT_BUDGET = 48 << 20     # conservative budget (v7x: 64 MiB physical / TC)
_VMEM_DEFAULT_SAFE = 12 << 20    # below the smallest scoped default (v5e: 16 MiB)


def _round_up(x, m):
    return (x + m - 1) // m * m


# ----------------------------- Pallas kernel --------------------------------
def _fused_mlp_kernel(x_ref, *refs, num_layers):
    """refs = (w0, b0, w1, b1, ..., w_{L-1}, b_{L-1}, o_ref).

    x_ref: (tm, in_pad) f32       w_i: (in_pad_i, out_pad_i) bf16
    b_i:   (1, out_pad_i) f32     o_ref: (tm, out_pad) f32  (lane-dense, 128k)
    Intermediates never leave vregs/VMEM; bf16 feeds the MXU, accumulation and
    the bias/ReLU epilogue stay in f32 (v5e-safe).
    """
    o_ref = refs[-1]
    wb = refs[:-1]
    h = x_ref[...]                                            # f32
    for i in range(num_layers):
        w = wb[2 * i][...]                                    # bf16
        b = wb[2 * i + 1][...]                                # f32
        h = jnp.dot(h.astype(jnp.bfloat16), w,
                    preferred_element_type=jnp.float32) + b   # f32 accumulate
        if i < num_layers - 1:
            h = jnp.maximum(h, 0.0)                           # f32 epilogue
    o_ref[...] = h.astype(o_ref.dtype)


def fused_mlp_pallas(x2d, prepared_params, *, tm, single_buffer_weights,
                     vmem_needed):
    """x2d: (Mp, in_pad) f32 with Mp % tm == 0.  prepared_params: [(w_bf16, b_f32), ...]."""
    Mp, in_pad = x2d.shape
    num_layers = len(prepared_params)
    out_pad = prepared_params[-1][0].shape[1]

    # Constant-index weights: single-buffer them when supported (double-buffering
    # a block that never changes is pure VMEM waste).
    wb_kwargs = {}
    if single_buffer_weights and hasattr(pl, "Buffered"):
        wb_kwargs = dict(pipeline_mode=pl.Buffered(1))

    in_specs = [pl.BlockSpec((tm, in_pad), lambda i: (i, 0))]
    flat_wb = []
    flops = 0
    bytes_accessed = x2d.size * x2d.dtype.itemsize + Mp * out_pad * 4
    for (w_t, b2) in prepared_params:
        in_specs.append(pl.BlockSpec(w_t.shape, lambda i: (0, 0), **wb_kwargs))
        in_specs.append(pl.BlockSpec(b2.shape, lambda i: (0, 0), **wb_kwargs))
        flat_wb.extend([w_t, b2])
        flops += 2 * Mp * w_t.shape[0] * w_t.shape[1]
        bytes_accessed += w_t.size * w_t.dtype.itemsize + b2.size * b2.dtype.itemsize

    compiler_kwargs = dict(dimension_semantics=("parallel",))  # row tiles independent
    if vmem_needed > _VMEM_DEFAULT_SAFE:
        # Only raise the scoped limit when the default might not suffice; stays
        # well under physical VMEM on v5e/v6e (128 MiB) and v7x (64 MiB/TC).
        compiler_kwargs["vmem_limit_bytes"] = int(
            min(_VMEM_SOFT_BUDGET, max(2 * vmem_needed, 32 << 20)))

    kernel = functools.partial(_fused_mlp_kernel, num_layers=num_layers)
    return pl.pallas_call(
        kernel,
        out_shape=jax.ShapeDtypeStruct((Mp, out_pad), jnp.float32),
        grid_spec=pltpu.PrefetchScalarGridSpec(
            num_scalar_prefetch=0,
            grid=(Mp // tm,),
            in_specs=in_specs,
            out_specs=pl.BlockSpec((tm, out_pad), lambda i: (i, 0)),
        ),
        compiler_params=pltpu.CompilerParams(**compiler_kwargs),
        cost_estimate=pl.CostEstimate(
            flops=flops, transcendentals=0, bytes_accessed=bytes_accessed),
    )(x2d, *flat_wb)


# ------------------------------ MLP wrapper ----------------------------------
def init_mlp_params(key, input_dim, hidden_dim, output_dim, num_layers):
    """PyTorch-shaped params: weight (out, in), bias (out,), U(-1/sqrt(fan_in), +)."""
    h = [hidden_dim] * (num_layers - 1)
    dims_in = [input_dim] + h
    dims_out = h + [output_dim]
    params = []
    for n, k in zip(dims_in, dims_out):
        key, kw, kb = jax.random.split(key, 3)
        bound = 1.0 / (n ** 0.5)
        w = jax.random.uniform(kw, (k, n), jnp.float32, -bound, bound)
        b = jax.random.uniform(kb, (k,), jnp.float32, -bound, bound)
        params.append((w, b))
    return params


def prepare_mlp_params(params):
    """One-time prep (NOT per forward): transpose weights to (in, out), zero-pad
    every in/out dim to a multiple of 128 lanes, cast weights to bf16 (MXU
    inputs), keep biases f32 as (1, out_pad) for the f32 epilogue."""
    prepared = []
    for (w, b) in params:
        out_d, in_d = w.shape
        in_pad = _round_up(in_d, _LANE)
        out_pad = _round_up(out_d, _LANE)
        w_t = jnp.transpose(w)                                   # (in, out)
        w_t = jnp.pad(w_t, ((0, in_pad - in_d), (0, out_pad - out_d)))
        b2 = jnp.pad(b.reshape(1, -1), ((0, 0), (0, out_pad - out_d)))
        prepared.append((w_t.astype(jnp.bfloat16), b2.astype(jnp.float32)))
    return prepared


def _pick_row_tile(m8, max_tile):
    """8-aligned row tile <= max_tile that (a) yields >= 2 grid steps when
    m8 >= 16 (so 'parallel' can shard across v7x's 2 TCs; ~0.35us extra step on
    single-TC chips is noise) and (b) minimizes row-padding waste; ties -> the
    larger tile (fewer grid steps)."""
    max_tile = max(_SUBLANE, max_tile // _SUBLANE * _SUBLANE)
    if m8 <= _SUBLANE:
        return _SUBLANE
    if m8 >= 2 * _SUBLANE:
        upper = min(max_tile, _round_up(-(-m8 // 2), _SUBLANE))
    else:
        upper = min(max_tile, m8)
    upper = max(upper, _SUBLANE)
    best_tm, best_waste = _SUBLANE, None
    for tm in range(_SUBLANE, upper + 1, _SUBLANE):
        waste = -(-m8 // tm) * tm - m8
        if best_waste is None or waste < best_waste or \
           (waste == best_waste and tm >= best_tm):
            best_tm, best_waste = tm, waste
    return best_tm


def mlp_forward(x, prepared_params, out_dim, single_buffer_weights=True):
    """x: (..., input_dim) -> (..., out_dim); matches PyTorch MLP.forward."""
    lead_shape = x.shape[:-1]
    in_dim = x.shape[-1]
    x2d = x.reshape((-1, in_dim))
    M = x2d.shape[0]

    in_pad = prepared_params[0][0].shape[0]
    out_pad = prepared_params[-1][0].shape[1]
    max_pad = max(in_pad, max(w.shape[1] for w, _ in prepared_params))

    # ---- VMEM budget for the resident-weights design -------------------------
    wb_factor = 1 if single_buffer_weights else 2
    resident = wb_factor * sum(w.size * w.dtype.itemsize + b.size * b.dtype.itemsize
                               for w, b in prepared_params)
    if resident > int(0.6 * _VMEM_SOFT_BUDGET):
        # TODO(synk): stream weight layers (layer grid axis / pltpu.emit_pipeline)
        # instead of keeping them all resident, for very large hidden dims.
        raise NotImplementedError(
            "fused MLP: resident weights exceed the VMEM budget; layer streaming "
            "is not implemented")
    # per-row bytes: double-buffered x + out tiles, plus f32/bf16 intermediates.
    per_row = 2 * 4 * in_pad + 2 * 4 * out_pad + 4 * 4 * max_pad
    max_tile_by_vmem = max(
        _SUBLANE,
        ((_VMEM_SOFT_BUDGET - resident) // max(per_row, 1)) // _SUBLANE * _SUBLANE)

    # ---- Row tiling: 8-aligned, >=2 tiles when possible, minimal padding -----
    M8 = _round_up(max(M, 1), _SUBLANE)
    tm = _pick_row_tile(M8, min(_MAX_ROW_TILE, max_tile_by_vmem))
    Mp = -(-M8 // tm) * tm

    # Pad rows to Mp and columns to the lane-padded input width (zero weight
    # rows make the padded columns inert).
    x2d = jnp.pad(x2d, ((0, Mp - M), (0, in_pad - in_dim)))

    vmem_needed = resident + tm * per_row
    out = fused_mlp_pallas(x2d, prepared_params, tm=tm,
                           single_buffer_weights=single_buffer_weights,
                           vmem_needed=vmem_needed)
    out = out[:M, :out_dim]
    return out.reshape(lead_shape + (out_dim,))


# ----------------------------- References -----------------------------------
def mlp_reference(x, params):
    """Pure-JAX f32 reference matching the PyTorch module exactly."""
    num_layers = len(params)
    for i, (w, b) in enumerate(params):
        x = x @ w.T + b
        if i < num_layers - 1:
            x = jnp.maximum(x, 0.0)
    return x


def mlp_reference_bf16(x, params):
    """Reference mimicking the kernel numerics: bf16 MXU inputs, f32 accumulate,
    f32 bias/ReLU epilogue."""
    num_layers = len(params)
    h = x
    for i, (w, b) in enumerate(params):
        h = jnp.dot(h.astype(jnp.bfloat16), jnp.transpose(w).astype(jnp.bfloat16),
                    preferred_element_type=jnp.float32) + b
        if i < num_layers - 1:
            h = jnp.maximum(h, 0.0)
    return h


if __name__ == "__main__":
    key = jax.random.PRNGKey(0)
    k_x, k_p = jax.random.split(key)

    batch, seq, input_dim = 2, 8, 32
    hidden_dim, output_dim, num_layers = 32, 4, 3

    x = jax.random.normal(k_x, (batch, seq, input_dim), jnp.float32)
    params = init_mlp_params(k_p, input_dim, hidden_dim, output_dim, num_layers)
    prepared = prepare_mlp_params(params)   # one-time transpose / pad / bf16 cast

    def run(single_buffer):
        fwd = jax.jit(functools.partial(mlp_forward, out_dim=output_dim,
                                        single_buffer_weights=single_buffer))
        return jax.block_until_ready(fwd(x, prepared))

    try:
        out = run(True)
    except Exception:
        # Fallback if this jax build rejects pipeline_mode=pl.Buffered(1) on
        # the resident weight BlockSpecs: default double buffering.
        out = run(False)

    ref32 = mlp_reference(x, params)
    refbf = mlp_reference_bf16(x, params)
    assert out.shape == (batch, seq, output_dim), out.shape
    # Tight check vs a reference with identical (bf16-in / f32-acc) numerics.
    assert jnp.allclose(out, refbf, atol=2e-3, rtol=2e-3), "mismatch vs bf16 reference"
    # Loose sanity check vs the full-f32 PyTorch-equivalent reference.
    assert jnp.allclose(out, ref32, atol=5e-2, rtol=5e-2), "mismatch vs f32 reference"

    print("KERNEL_OK")
</pallas_src>

<mosaic_0001>
module attributes {stable_mosaic.version = 11 : i64} {
  func.func @_fused_mlp_kernel(%arg0: i32, %arg1: memref<8x128xf32, #tpu.memory_space<vmem>>, %arg2: memref<128x128xbf16, #tpu.memory_space<vmem>>, %arg3: memref<1x128xf32, #tpu.memory_space<vmem>>, %arg4: memref<128x128xbf16, #tpu.memory_space<vmem>>, %arg5: memref<1x128xf32, #tpu.memory_space<vmem>>, %arg6: memref<128x128xbf16, #tpu.memory_space<vmem>>, %arg7: memref<1x128xf32, #tpu.memory_space<vmem>>, %arg8: memref<8x128xf32, #tpu.memory_space<vmem>>) attributes {dimension_semantics = [#tpu.dimension_semantics<parallel>], iteration_bounds = array<i64: 2>, scalar_prefetch = 0 : i64, scratch_operands = 0 : i64, tpu.core_type = #tpu.core_type<tc>, window_params = [{transform_indices = @transform_0, window_bounds = array<i64: 8, 128>}, {pipeline_mode = #tpu.pipeline_mode<synchronous>, transform_indices = @transform_1, window_bounds = array<i64: 128, 128>}, {pipeline_mode = #tpu.pipeline_mode<synchronous>, transform_indices = @transform_2, window_bounds = array<i64: 1, 128>}, {pipeline_mode = #tpu.pipeline_mode<synchronous>, transform_indices = @transform_3, window_bounds = array<i64: 128, 128>}, {pipeline_mode = #tpu.pipeline_mode<synchronous>, transform_indices = @transform_4, window_bounds = array<i64: 1, 128>}, {pipeline_mode = #tpu.pipeline_mode<synchronous>, transform_indices = @transform_5, window_bounds = array<i64: 128, 128>}, {pipeline_mode = #tpu.pipeline_mode<synchronous>, transform_indices = @transform_6, window_bounds = array<i64: 1, 128>}, {transform_indices = @transform_7, window_bounds = array<i64: 8, 128>}]} {
    %c0 = arith.constant 0 : index
    %c0_0 = arith.constant 0 : index
    %0 = vector.load %arg1[%c0, %c0_0] : memref<8x128xf32, #tpu.memory_space<vmem>>, vector<8x128xf32>
    %c0_1 = arith.constant 0 : index
    %c0_2 = arith.constant 0 : index
    %1 = vector.load %arg2[%c0_1, %c0_2] : memref<128x128xbf16, #tpu.memory_space<vmem>>, vector<128x128xbf16>
    %c0_3 = arith.constant 0 : index
    %c0_4 = arith.constant 0 : index
    %2 = vector.load %arg3[%c0_3, %c0_4] : memref<1x128xf32, #tpu.memory_space<vmem>>, vector<1x128xf32>
    %3 = arith.truncf %0 : vector<8x128xf32> to vector<8x128xbf16>
    %cst = arith.constant dense<0.000000e+00> : vector<8x128xf32>
    %4 = tpu.matmul %3, %1, %cst {dimension_numbers = #tpu.dot_dimension_numbers<[1], [0], [0], [1], [0, 0, 1, 1], [], []>} : vector<8x128xbf16>, vector<128x128xbf16>, vector<8x128xf32> -> vector<8x128xf32>
    %5 = vector.broadcast %2 : vector<1x128xf32> to vector<8x128xf32>
    %6 = arith.addf %4, %5 : vector<8x128xf32>
    %cst_5 = arith.constant 0.000000e+00 : f32
    %7 = vector.broadcast %cst_5 : f32 to vector<8x128xf32>
    %8 = arith.maximumf %6, %7 : vector<8x128xf32>
    %c0_6 = arith.constant 0 : index
    %c0_7 = arith.constant 0 : index
    %9 = vector.load %arg4[%c0_6, %c0_7] : memref<128x128xbf16, #tpu.memory_space<vmem>>, vector<128x128xbf16>
    %c0_8 = arith.constant 0 : index
    %c0_9 = arith.constant 0 : index
    %10 = vector.load %arg5[%c0_8, %c0_9] : memref<1x128xf32, #tpu.memory_space<vmem>>, vector<1x128xf32>
    %11 = arith.truncf %8 : vector<8x128xf32> to vector<8x128xbf16>
    %cst_10 = arith.constant dense<0.000000e+00> : vector<8x128xf32>
    %12 = tpu.matmul %11, %9, %cst_10 {dimension_numbers = #tpu.dot_dimension_numbers<[1], [0], [0], [1], [0, 0, 1, 1], [], []>} : vector<8x128xbf16>, vector<128x128xbf16>, vector<8x128xf32> -> vector<8x128xf32>
    %13 = vector.broadcast %10 : vector<1x128xf32> to vector<8x128xf32>
    %14 = arith.addf %12, %13 : vector<8x128xf32>
    %cst_11 = arith.constant 0.000000e+00 : f32
    %15 = vector.broadcast %cst_11 : f32 to vector<8x128xf32>
    %16 = arith.maximumf %14, %15 : vector<8x128xf32>
    %c0_12 = arith.constant 0 : index
    %c0_13 = arith.constant 0 : index
    %17 = vector.load %arg6[%c0_12, %c0_13] : memref<128x128xbf16, #tpu.memory_space<vmem>>, vector<128x128xbf16>
    %c0_14 = arith.constant 0 : index
    %c0_15 = arith.constant 0 : index
    %18 = vector.load %arg7[%c0_14, %c0_15] : memref<1x128xf32, #tpu.memory_space<vmem>>, vector<1x128xf32>
    %19 = arith.truncf %16 : vector<8x128xf32> to vector<8x128xbf16>
    %cst_16 = arith.constant dense<0.000000e+00> : vector<8x128xf32>
    %20 = tpu.matmul %19, %17, %cst_16 {dimension_numbers = #tpu.dot_dimension_numbers<[1], [0], [0], [1], [0, 0, 1, 1], [], []>} : vector<8x128xbf16>, vector<128x128xbf16>, vector<8x128xf32> -> vector<8x128xf32>
    %21 = vector.broadcast %18 : vector<1x128xf32> to vector<8x128xf32>
    %22 = arith.addf %20, %21 : vector<8x128xf32>
    %c0_17 = arith.constant 0 : index
    %c0_18 = arith.constant 0 : index
    %23 = vector.load %arg8[%c0_17, %c0_18] : memref<8x128xf32, #tpu.memory_space<vmem>>, vector<8x128xf32>
    tpu.vector_store %arg8[%c0_17, %c0_18], %22 {strides = array<i32>} : memref<8x128xf32, #tpu.memory_space<vmem>>, vector<8x128xf32>,
    return
  }
  func.func @transform_0(%arg0: i32) -> (i32, i32) {
    %c0_i32 = arith.constant 0 : i32
    %c0_i32_0 = arith.constant 0 : i32
    return %arg0, %c0_i32 : i32, i32
  }
  func.func @transform_1(%arg0: i32) -> (i32, i32) {
    %c0_i32 = arith.constant 0 : i32
    %c0_i32_0 = arith.constant 0 : i32
    %c0_i32_1 = arith.constant 0 : i32
    return %c0_i32, %c0_i32_0 : i32, i32
  }
  func.func @transform_2(%arg0: i32) -> (i32, i32) {
    %c0_i32 = arith.constant 0 : i32
    %c0_i32_0 = arith.constant 0 : i32
    %c0_i32_1 = arith.constant 0 : i32
    return %c0_i32, %c0_i32_0 : i32, i32
  }
  func.func @transform_3(%arg0: i32) -> (i32, i32) {
    %c0_i32 = arith.constant 0 : i32
    %c0_i32_0 = arith.constant 0 : i32
    %c0_i32_1 = arith.constant 0 : i32
    return %c0_i32, %c0_i32_0 : i32, i32
  }
  func.func @transform_4(%arg0: i32) -> (i32, i32) {
    %c0_i32 = arith.constant 0 : i32
    %c0_i32_0 = arith.constant 0 : i32
    %c0_i32_1 = arith.constant 0 : i32
    return %c0_i32, %c0_i32_0 : i32, i32
  }
  func.func @transform_5(%arg0: i32) -> (i32, i32) {
    %c0_i32 = arith.constant 0 : i32
    %c0_i32_0 = arith.constant 0 : i32
    %c0_i32_1 = arith.constant 0 : i32
    return %c0_i32, %c0_i32_0 : i32, i32
  }
  func.func @transform_6(%arg0: i32) -> (i32, i32) {
    %c0_i32 = arith.constant 0 : i32
    %c0_i32_0 = arith.constant 0 : i32
    %c0_i32_1 = arith.constant 0 : i32
    return %c0_i32, %c0_i32_0 : i32, i32
  }
  func.func @transform_7(%arg0: i32) -> (i32, i32) {
    %c0_i32 = arith.constant 0 : i32
    %c0_i32_0 = arith.constant 0 : i32
    return %arg0, %c0_i32 : i32, i32
  }
}

module attributes {stable_mosaic.version = 11 : i64} {
  func.func @_fused_mlp_kernel(%arg0: i32, %arg1: memref<8x128xf32, #tpu.memory_space<vmem>>, %arg2: memref<128x128xbf16, #tpu.memory_space<vmem>>, %arg3: memref<1x128xf32, #tpu.memory_space<vmem>>, %arg4: memref<128x128xbf16, #tpu.memory_space<vmem>>, %arg5: memref<1x128xf32, #tpu.memory_space<vmem>>, %arg6: memref<128x128xbf16, #tpu.memory_space<vmem>>, %arg7: memref<1x128xf32, #tpu.memory_space<vmem>>, %arg8: memref<8x128xf32, #tpu.memory_space<vmem>>) attributes {dimension_semantics = [#tpu.dimension_semantics<parallel>], iteration_bounds = array<i64: 2>, scalar_prefetch = 0 : i64, scratch_operands = 0 : i64, tpu.core_type = #tpu.core_type<tc>, window_params = [{transform_indices = @transform_0, window_bounds = array<i64: 8, 128>}, {pipeline_mode = #tpu.pipeline_mode<synchronous>, transform_indices = @transform_1, window_bounds = array<i64: 128, 128>}, {pipeline_mode = #tpu.pipeline_mode<synchronous>, transform_indices = @transform_2, window_bounds = array<i64: 1, 128>}, {pipeline_mode = #tpu.pipeline_mode<synchronous>, transform_indices = @transform_3, window_bounds = array<i64: 128, 128>}, {pipeline_mode = #tpu.pipeline_mode<synchronous>, transform_indices = @transform_4, window_bounds = array<i64: 1, 128>}, {pipeline_mode = #tpu.pipeline_mode<synchronous>, transform_indices = @transform_5, window_bounds = array<i64: 128, 128>}, {pipeline_mode = #tpu.pipeline_mode<synchronous>, transform_indices = @transform_6, window_bounds = array<i64: 1, 128>}, {transform_indices = @transform_7, window_bounds = array<i64: 8, 128>}]} {
    %c0 = arith.constant 0 : index
    %c0_0 = arith.constant 0 : index
    %0 = vector.load %arg1[%c0, %c0_0] : memref<8x128xf32, #tpu.memory_space<vmem>>, vector<8x128xf32>
    %c0_1 = arith.constant 0 : index
    %c0_2 = arith.constant 0 : index
    %1 = vector.load %arg2[%c0_1, %c0_2] : memref<128x128xbf16, #tpu.memory_space<vmem>>, vector<128x128xbf16>
    %c0_3 = arith.constant 0 : index
    %c0_4 = arith.constant 0 : index
    %2 = vector.load %arg3[%c0_3, %c0_4] : memref<1x128xf32, #tpu.memory_space<vmem>>, vector<1x128xf32>
    %3 = arith.truncf %0 : vector<8x128xf32> to vector<8x128xbf16>
    %cst = arith.constant dense<0.000000e+00> : vector<8x128xf32>
    %4 = tpu.matmul %3, %1, %cst {dimension_numbers = #tpu.dot_dimension_numbers<[1], [0], [0], [1], [0, 0, 1, 1], [], []>} : vector<8x128xbf16>, vector<128x128xbf16>, vector<8x128xf32> -> vector<8x128xf32>
    %5 = vector.broadcast %2 : vector<1x128xf32> to vector<8x128xf32>
    %6 = arith.addf %4, %5 : vector<8x128xf32>
    %cst_5 = arith.constant 0.000000e+00 : f32
    %7 = vector.broadcast %cst_5 : f32 to vector<8x128xf32>
    %8 = arith.maximumf %6, %7 : vector<8x128xf32>
    %c0_6 = arith.constant 0 : index
    %c0_7 = arith.constant 0 : index
    %9 = vector.load %arg4[%c0_6, %c0_7] : memref<128x128xbf16, #tpu.memory_space<vmem>>, vector<128x128xbf16>
    %c0_8 = arith.constant 0 : index
    %c0_9 = arith.constant 0 : index
    %10 = vector.load %arg5[%c0_8, %c0_9] : memref<1x128xf32, #tpu.memory_space<vmem>>, vector<1x128xf32>
    %11 = arith.truncf %8 : vector<8x128xf32> to vector<8x128xbf16>
    %cst_10 = arith.constant dense<0.000000e+00> : vector<8x128xf32>
    %12 = tpu.matmul %11, %9, %cst_10 {dimension_numbers = #tpu.dot_dimension_numbers<[1], [0], [0], [1], [0, 0, 1, 1], [], []>} : vector<8x128xbf16>, vector<128x128xbf16>, vector<8x128xf32> -> vector<8x128xf32>
    %13 = vector.broadcast %10 : vector<1x128xf32> to vector<8x128xf32>
    %14 = arith.addf %12, %13 : vector<8x128xf32>
    %cst_11 = arith.constant 0.000000e+00 : f32
    %15 = vector.broadcast %cst_11 : f32 to vector<8x128xf32>
    %16 = arith.maximumf %14, %15 : vector<8x128xf32>
    %c0_12 = arith.constant 0 : index
    %c0_13 = arith.constant 0 : index
    %17 = vector.load %arg6[%c0_12, %c0_13] : memref<128x128xbf16, #tpu.memory_space<vmem>>, vector<128x128xbf16>
    %c0_14 = arith.constant 0 : index
    %c0_15 = arith.constant 0 : index
    %18 = vector.load %arg7[%c0_14, %c0_15] : memref<1x128xf32, #tpu.memory_space<vmem>>, vector<1x128xf32>
    %19 = arith.truncf %16 : vector<8x128xf32> to vector<8x128xbf16>
    %cst_16 = arith.constant dense<0.000000e+00> : vector<8x128xf32>
    %20 = tpu.matmul %19, %17, %cst_16 {dimension_numbers = #tpu.dot_dimension_numbers<[1], [0], [0], [1], [0, 0, 1, 1], [], []>} : vector<8x128xbf16>, vector<128x128xbf16>, vector<8x128xf32> -> vector<8x128xf32>
    %21 = vector.broadcast %18 : vector<1x128xf32> to vector<8x128xf32>
    %22 = arith.addf %20, %21 : vector<8x128xf32>
    %c0_17 = arith.constant 0 : index
    %c0_18 = arith.constant 0 : index
    %23 = vector.load %arg8[%c0_17, %c0_18] : memref<8x128xf32, #tpu.memory_space<vmem>>, vector<8x128xf32>
    tpu.vector_store %arg8[%c0_17, %c0_18], %22 {strides = array<i32>} : memref<8x128xf32, #tpu.memory_space<vmem>>, vector<8x128xf32>,
    return
  }
  func.func @transform_0(%arg0: i32) -> (i32, i32) {
    %c0_i32 = arith.constant 0 : i32
    %c0_i32_0 = arith.constant 0 : i32
    return %arg0, %c0_i32 : i32, i32
  }
  func.func @transform_1(%arg0: i32) -> (i32, i32) {
    %c0_i32 = arith.constant 0 : i32
    %c0_i32_0 = arith.constant 0 : i32
    %c0_i32_1 = arith.constant 0 : i32
    return %c0_i32, %c0_i32_0 : i32, i32
  }
  func.func @transform_2(%arg0: i32) -> (i32, i32) {
    %c0_i32 = arith.constant 0 : i32
    %c0_i32_0 = arith.constant 0 : i32
    %c0_i32_1 = arith.constant 0 : i32
    return %c0_i32, %c0_i32_0 : i32, i32
  }
  func.func @transform_3(%arg0: i32) -> (i32, i32) {
    %c0_i32 = arith.constant 0 : i32
    %c0_i32_0 = arith.constant 0 : i32
    %c0_i32_1 = arith.constant 0 : i32
    return %c0_i32, %c0_i32_0 : i32, i32
  }
  func.func @transform_4(%arg0: i32) -> (i32, i32) {
    %c0_i32 = arith.constant 0 : i32
    %c0_i32_0 = arith.constant 0 : i32
    %c0_i32_1 = arith.constant 0 : i32
    return %c0_i32, %c0_i32_0 : i32, i32
  }
  func.func @transform_5(%arg0: i32) -> (i32, i32) {
    %c0_i32 = arith.constant 0 : i32
    %c0_i32_0 = arith.constant 0 : i32
    %c0_i32_1 = arith.constant 0 : i32
    return %c0_i32, %c0_i32_0 : i32, i32
  }
  func.func @transform_6(%arg0: i32) -> (i32, i32) {
    %c0_i32 = arith.constant 0 : i32
    %c0_i32_0 = arith.constant 0 : i32
    %c0_i32_1 = arith.constant 0 : i32
    return %c0_i32, %c0_i32_0 : i32, i32
  }
  func.func @transform_7(%arg0: i32) -> (i32, i32) {
    %c0_i32 = arith.constant 0 : i32
    %c0_i32_0 = arith.constant 0 : i32
    return %arg0, %c0_i32 : i32, i32
  }
}

</mosaic_0001>

<bundles_post_ra>
// kernel: mlp_forward.1
= control target key start
LH: loop header
LB: loop body
LE: loop exit
PB: predicated region body
PF: predicated region fallthrough
CT: control target
= control target key end

     0   :  { %12 = vsyncpa [#allocation3], 0  ;;  %s1203_s0 = inlined_call_operand.vmem [shape: f32[16,128], index: 0, kind: input, shape index: {}]   ;;  %s1204_s1 = inlined_call_operand.hbm [shape: bf16[128,128], index: 1, kind: input, shape index: {}]   ;;  %s1205_s2 = inlined_call_operand.vmem [shape: f32[1,128], index: 2, kind: input, shape index: {}]   ;;  %s1206_s3 = inlined_call_operand.hbm [shape: bf16[128,128], index: 3, kind: input, shape index: {}]   ;;  %s1207_s4 = inlined_call_operand.vmem [shape: f32[1,128], index: 4, kind: input, shape index: {}]   ;;  %s1208_s5 = inlined_call_operand.hbm [shape: bf16[128,128], index: 5, kind: input, shape index: {}]   ;;  %s1209_s6 = inlined_call_operand.vmem [shape: f32[1,128], index: 6, kind: input, shape index: {}]   ;;  %s1210_s7 = inlined_call_operand.vmem [shape: f32[16,128], index: 7, kind: output, shape index: {}]  }
   0x1   :  { %13 = vsyncpa [#allocation5], 0  ;;  %s1080_s24 = smov 0  }
   0x2 LB: > { %s1086_s25 = sadd.s32 4294967295, %s1031_s24   ;;  %p745_p0 = scmp.ge.s32.totalorder %s1031_s24, 1  ;;  %s1031_s24 = sphi %s1080_s24, %s19_s24  }
   0x3   : > { %p202_p1 = scmp.lt.s32.totalorder %s1031_s24, 3  ;;  %p894_p2 = scmp.eq.s32.totalorder %s1086_s25, 0 }
   0x4   : > { %s1033_s27 = smov [#allocation4]   ;;  %s1034_s29 = smov [#allocation2]  }
   0x5   : > { %p1091_p3 = pnand %p745_p0, %p202_p1  ;;  %s230_s28 = sshll.u32 %s1033_s27, 4  ;;  %s231_s28 = int_to_ptr.vmem [resolvable:$true] %s230_s28 }
   0x6   : > { %s214_s30 = sshll.u32 %s1034_s29, 4  ;;  %s1035_s9 = smov [#allocation6]   ;;  %s215_s30 = int_to_ptr.vmem [resolvable:$true] %s214_s30 }
   0x7   : > { %p884_p4 = pneg %p1091_p3  ;;  %s246_s10 = sshll.u32 %s1035_s9, 4  ;;  %s1103_s10 = int_to_ptr.vmem [resolvable:$true] %s246_s10 }
   0x8   : > { %s950_s11 = scalar_lea.vmem %s231_s28, 1024  ;;  %p958_p10 = scmp.lt.s32.totalorder %s231_s28, %s231_s28 }
   0x9   : > { %p1099_p5 = pnand %p894_p2, %p884_p4  ;;  %p951_p7 = scmp.ne.s32.totalorder %s231_s28, %s950_s11 }
   0xa   : > { %p959_p11 = scmp.lt.s32.totalorder %s950_s11, %s950_s11 }
   0xb   : > { %p941_p6 = pneg %p1099_p5 }
   0xc   : > { %p960_p12 = por %p959_p11, %p958_p10 }
   0xd   : > { %p953_p8 = pnand %p951_p7, %p941_p6 }
   0xf   : > { %p954_p9 = pneg %p953_p8 }
  0x11   : > { %p961_p13 = pnand %p960_p12, %p954_p9 }
  0x13   : > { %964 = shalt.err (!%p961_p13)
}
  0x14   : > { %s1036_s12 = smov 64   ;;  %s1037_s13 = smov 4  }
  0x15   : > { %890 = dma.hbm_to_vmem [thread:$0]  (!%p1099_p5), %s1206_s3, 1024, %s231_s28, [#allocation5], %s1036_s12, %s1036_s12, %s1037_s13  }
  0x16   : > { %s976_s16 = scalar_lea.vmem %s215_s30, 1024  ;;  %p984_p7 = scmp.lt.s32.totalorder %s215_s30, %s215_s30 }
  0x17   : > { %p977_p0 = scmp.ne.s32.totalorder %s215_s30, %s976_s16  ;;  %p985_p8 = scmp.lt.s32.totalorder %s976_s16, %s976_s16 }
  0x19   : > { %p979_p1 = pnand %p977_p0, %p941_p6  ;;  %p986_p10 = por %p985_p8, %p984_p7 }
  0x1b   : > { %p980_p4 = pneg %p979_p1 }
  0x1d   : > { %p987_p9 = pnand %p986_p10, %p980_p4 }
  0x1f   : > { %990 = shalt.err (!%p987_p9)
}
  0x20   : > { %887 = dma.hbm_to_vmem [thread:$0]  (!%p1099_p5), %s1204_s1, 1024, %s215_s30, [#allocation3], %s1036_s12, %s1036_s12, %s1037_s13  }
  0x21   : > { %s1002_s19 = scalar_lea.vmem %s1103_s10, 1024  ;;  %p1010_p0 = scmp.lt.s32.totalorder %s1103_s10, %s1103_s10 }
  0x22   : > { %p1003_p11 = scmp.ne.s32.totalorder %s1103_s10, %s1002_s19  ;;  %p1011_p1 = scmp.lt.s32.totalorder %s1002_s19, %s1002_s19 }
  0x24   : > { %p1005_p12 = pnand %p1003_p11, %p941_p6  ;;  %p1012_p4 = por %p1011_p1, %p1010_p0 }
  0x26   : > { %p1006_p13 = pneg %p1005_p12 }
  0x28   : > { %p1013_p7 = pnand %p1012_p4, %p1006_p13 }
  0x2a   : > { %1016 = shalt.err (!%p1013_p7)
}
  0x2b   : > { %893 = dma.hbm_to_vmem [thread:$0]  (!%p1099_p5), %s1208_s5, 1024, %s1103_s10, [#allocation5], %s1036_s12, %s1036_s12, %s1037_s13  }
  0x2c   : > { %272 = sbr.rel (%p1091_p3) target bundleno = 683 (0x2ab), region = 48 }
  0x31   : > { %1022 = dma.done.wait (%p894_p2), [#allocation3], 1024  }
  0x32   : > { %1024 = vsyncadd (%p894_p2), [#allocation3], 4294966272 }
  0x33   : > { %1026 = dma.done.wait (%p894_p2), [#allocation5], 2048  }
  0x34   : > { %1028 = vsyncadd (%p894_p2), [#allocation5], 4294965248  ;;  %v1038_v0 = vmov 0.0   ;;  %vm1039_vm0 = vmmov 0   ;;  %v915_v1 = vld [vmem:[#allocation2 + $0x38] sm:$0xff]   ;;  %v916_v2 = vld [vmem:[#allocation2 + $0x30] sm:$0xff]  }
  0x35   : > { %812 = vmatprep.subr.bf16.mxu0 %v1038_v0  ;;  %828 = vmatprep.mubr.msk.bf16.mxu0 %vm1039_vm0, %v1038_v0  ;;  %v917_v3 = vld [vmem:[#allocation2 + $0x28] sm:$0xff]   ;;  %p310_p2 = scmp.lt.s32.totalorder %s1086_s25, 1  ;;  %v923_v4 = vld [vmem:[#allocation4 + $0x38] sm:$0xff]   ;;  %v918_v5 = vld [vmem:[#allocation2 + $0x20] sm:$0xff]  }
  0x36   : > { %832 = vmatprep.subr.bf16.mxu1 %v1038_v0  ;;  %848 = vmatprep.mubr.msk.bf16.mxu1 %vm1039_vm0, %v1038_v0  ;;  %v924_v6 = vld [vmem:[#allocation4 + $0x30] sm:$0xff]   ;;  %v919_v7 = vld [vmem:[#allocation2 + $0x18] sm:$0xff]   ;;  %v925_v8 = vld [vmem:[#allocation4 + $0x28] sm:$0xff]  }
  0x37   : > { %813 = vmatpush3.bf16.msra.mxu0 %v915_v1  ;;  %s1214_s25 = smov (!%p310_p2, %s1086_s25), 1  ;;  %833 = vmatpush3.bf16.msra.mxu1 %v923_v4  ;;  %v920_v9 = vld [vmem:[#allocation2 + $0x10] sm:$0xff]   ;;  %v926_v10 = vld [vmem:[#allocation4 + $0x20] sm:$0xff]   ;;  %v921_v11 = vld [vmem:[#allocation2 + $0x8] sm:$0xff]  }
  0x38   : > { %814 = vmatprep.subr.bf16.mxu0 %v1038_v0  ;;  %834 = vmatprep.subr.bf16.mxu1 %v1038_v0  ;;  %s754_s22 = sshll.u32 %s1214_s25, 3  ;;  %v927_v12 = vld [vmem:[#allocation4 + $0x18] sm:$0xff]   ;;  %v922_v13 = vld [vmem:[#allocation2] sm:$0xff]   ;;  %v928_v15 = vld [vmem:[#allocation4 + $0x10] sm:$0xff]  }
  0x39   : > { %s313_s27 = scalar_lea.vmem %s1203_s0, %s754_s22  ;;  %v929_v17 = vld [vmem:[#allocation4 + $0x8] sm:$0xff]   ;;  %v930_v18 = vld [vmem:[#allocation4] sm:$0xff]   ;;  %v931_v19 = vld [vmem:[#allocation6 + $0x38] sm:$0xff]   ;;  %s317_s13 = scalar_lea.vmem %s1210_s7, %s754_s22 }
  0x3a   : > { %v319_v14 = vld [vmem:[%s313_s27] sm:$0xff]  ;;  %v932_v20 = vld [vmem:[#allocation6 + $0x30] sm:$0xff]   ;;  %v933_v21 = vld [vmem:[#allocation6 + $0x28] sm:$0xff]  }
  0x3b   : > { %815 = vmatpush3.bf16.msra.mxu0 %v916_v2  ;;  %835 = vmatpush3.bf16.msra.mxu1 %v924_v6  ;;  %v337_v16 = vpack.c.bf16 %v319_v14, %v319_v14  ;;  %v934_v22 = vld [vmem:[#allocation6 + $0x20] sm:$0xff]   ;;  %v935_v23 = vld [vmem:[#allocation6 + $0x18] sm:$0xff]   ;;  %v936_v24 = vld [vmem:[#allocation6 + $0x10] sm:$0xff]  }
  0x3c   : > { %816 = vmatprep.subr.bf16.mxu0 %v1038_v0  ;;  %836 = vmatprep.subr.bf16.mxu1 %v1038_v0  ;;  %v756_v25 = vld [vmem:[%s1205_s2] ss:$0 sm:$0xff]  ;;  %v937_v33 = vld [vmem:[#allocation6 + $0x8] sm:$0xff]  }
  0x3d   : > { %v938_v34 = vld [vmem:[#allocation6] sm:$0xff]  }
  0x3e   : > { %v765_v35 = vld [vmem:[%s1207_s4] ss:$0 sm:$0xff] }
  0x3f   : > { %817 = vmatpush3.bf16.msra.mxu0 %v917_v3  ;;  %837 = vmatpush3.bf16.msra.mxu1 %v925_v8  ;;  %v774_v43 = vld [vmem:[%s1209_s6] ss:$0 sm:$0xff] }
  0x40   : > { %818 = vmatprep.subr.bf16.mxu0 %v1038_v0  ;;  %838 = vmatprep.subr.bf16.mxu1 %v1038_v0 }
  0x43   : > { %819 = vmatpush3.bf16.msra.mxu0 %v918_v5  ;;  %839 = vmatpush3.bf16.msra.mxu1 %v926_v10 }
  0x44   : > { %820 = vmatprep.subr.bf16.mxu0 %v1038_v0  ;;  %840 = vmatprep.subr.bf16.mxu1 %v1038_v0 }
  0x47   : > { %821 = vmatpush3.bf16.msra.mxu0 %v919_v7  ;;  %841 = vmatpush3.bf16.msra.mxu1 %v927_v12 }
  0x48   : > { %822 = vmatprep.subr.bf16.mxu0 %v1038_v0  ;;  %842 = vmatprep.subr.bf16.mxu1 %v1038_v0 }
  0x4b   : > { %823 = vmatpush3.bf16.msra.mxu0 %v920_v9  ;;  %843 = vmatpush3.bf16.msra.mxu1 %v928_v15 }
  0x4c   : > { %824 = vmatprep.subr.bf16.mxu0 %v1038_v0  ;;  %844 = vmatprep.subr.bf16.mxu1 %v1038_v0 }
  0x4f   : > { %825 = vmatpush3.bf16.msra.mxu0 %v921_v11  ;;  %845 = vmatpush3.bf16.msra.mxu1 %v929_v17 }
  0x50   : > { %826 = vmatprep.subr.bf16.mxu0 %v1038_v0  ;;  %846 = vmatprep.subr.bf16.mxu1 %v1038_v0 }
  0x53   : > { %827 = vmatpush3.bf16.msra.mxu0 %v922_v13  ;;  %847 = vmatpush3.bf16.msra.mxu1 %v930_v18 }
  0x54   : > { %852 = vmatprep.subr.bf16.mxu0 %v1038_v0 }
  0x56   : > { %829 = vmatmul.mubr.bf16.vlgmr.msra.gmra.mxu0 %v337_v16 }
  0x57   : > { %868 = vmatprep.mubr.msk.bf16.mxu0 %vm1039_vm0, %v1038_v0  ;;  %853 = vmatpush3.bf16.msra.mxu0 %v931_v19 }
  0x58   : > { %854 = vmatprep.subr.bf16.mxu0 %v1038_v0 }
  0x5b   : > { %855 = vmatpush3.bf16.msra.mxu0 %v932_v20 }
  0x5c   : > { %856 = vmatprep.subr.bf16.mxu0 %v1038_v0 }
  0x5f   : > { %857 = vmatpush3.bf16.msra.mxu0 %v933_v21 }
  0x60   : > { %858 = vmatprep.subr.bf16.mxu0 %v1038_v0 }
  0x63   : > { %859 = vmatpush3.bf16.msra.mxu0 %v934_v22 }
  0x64   : > { %860 = vmatprep.subr.bf16.mxu0 %v1038_v0 }
  0x67   : > { %861 = vmatpush3.bf16.msra.mxu0 %v935_v23 }
  0x68   : > { %862 = vmatprep.subr.bf16.mxu0 %v1038_v0 }
  0x6b   : > { %863 = vmatpush3.bf16.msra.mxu0 %v936_v24 }
  0x6c   : > { %864 = vmatprep.subr.bf16.mxu0 %v1038_v0 }
  0x6f   : > { %865 = vmatpush3.bf16.msra.mxu0 %v937_v33 }
  0x70   : > { %866 = vmatprep.subr.bf16.mxu0 %v1038_v0 }
  0x73   : > { %867 = vmatpush3.bf16.msra.mxu0 %v938_v34 }
 0x116   : > { %v426_v26 = vpop.f32.mrf.mxu0 }
 0x117   : > { %v427_v27 = vadd.f32 %v756_v25, %v426_v26 }
 0x118   : > { %v830_v28 = vpop.f32.mrf.mxu0 }
 0x119   : > { %v432_v29 = vmax.f32 %v427_v27, 0.0 }
 0x11a   : > { %v429_v30 = vpop.f32.mrf.mxu0 }
 0x11b   : > { %v450_v31 = vpack.c.bf16 %v432_v29, %v432_v29 }
 0x11c   : > { %v831_v32 = vpop.f32.mrf.mxu0 }
 0x11d   : > { %849 = vmatmul.mubr.bf16.vlgmr.msra.gmra.mxu1 %v450_v31 }
 0x1dd   : > { %v539_v36 = vpop.f32.mrf.mxu1 }
 0x1de   : > { %v540_v37 = vadd.f32 %v765_v35, %v539_v36 }
 0x1df   : > { %v850_v38 = vpop.f32.mrf.mxu1 }
 0x1e0   : > { %v545_v39 = vmax.f32 %v540_v37, 0.0 }
 0x1e1   : > { %v542_v40 = vpop.f32.mrf.mxu1 }
 0x1e2   : > { %v563_v41 = vpack.c.bf16 %v545_v39, %v545_v39 }
 0x1e3   : > { %v851_v42 = vpop.f32.mrf.mxu1 }
 0x1e4   : > { %869 = vmatmul.mubr.bf16.vlgmr.msra.gmra.mxu0 %v563_v41 }
 0x2a4   : > { %v652_v44 = vpop.f32.mrf.mxu0 }
 0x2a5   : > { %v653_v45 = vadd.f32 %v774_v43, %v652_v44 }
 0x2a6   : > { %v870_v46 = vpop.f32.mrf.mxu0 }
 0x2a7   : > { %658 = vst [vmem:[%s317_s13] sm:$0xff] %v653_v45 }
 0x2a8   : > { %v655_v47 = vpop.f32.mrf.mxu0 }
 0x2aa   : > { %v871_v48 = vpop.f32.mrf.mxu0 }
 0x2ab PF: > { %s19_s24 = sadd.s32 1, %s1031_s24  }
 0x2ac   : > { %p16_p3 = scmp.ge.s32.totalorder %s19_s24, 4  }
 0x2ae   :  { %18 = sbr.rel (!%p16_p3) target bundleno = 2 (0x2), region = 91 }
 0x2b3   :  { %678 = vsyncpa [#allocation3], 1 }
 0x2b4   :  { %680 = vsyncpa [#allocation3 + $0x1], 1 }
 0x2b5   :  { %681 = vsyncpa [#allocation5], 1 }

// kernel: mlp_forward.1
= control target key start
LH: loop header
LB: loop body
LE: loop exit
PB: predicated region body
PF: predicated region fallthrough
CT: control target
= control target key end

     0   :  { %12 = vsyncpa [#allocation3], 0  ;;  %s1203_s0 = inlined_call_operand.vmem [shape: f32[16,128], index: 0, kind: input, shape index: {}]   ;;  %s1204_s1 = inlined_call_operand.hbm [shape: bf16[128,128], index: 1, kind: input, shape index: {}]   ;;  %s1205_s2 = inlined_call_operand.vmem [shape: f32[1,128], index: 2, kind: input, shape index: {}]   ;;  %s1206_s3 = inlined_call_operand.hbm [shape: bf16[128,128], index: 3, kind: input, shape index: {}]   ;;  %s1207_s4 = inlined_call_operand.vmem [shape: f32[1,128], index: 4, kind: input, shape index: {}]   ;;  %s1208_s5 = inlined_call_operand.hbm [shape: bf16[128,128], index: 5, kind: input, shape index: {}]   ;;  %s1209_s6 = inlined_call_operand.vmem [shape: f32[1,128], index: 6, kind: input, shape index: {}]   ;;  %s1210_s7 = inlined_call_operand.vmem [shape: f32[16,128], index: 7, kind: output, shape index: {}]  }
   0x1   :  { %13 = vsyncpa [#allocation5], 0  ;;  %s1080_s24 = smov 0  }
   0x2 LB: > { %s1086_s25 = sadd.s32 4294967295, %s1031_s24   ;;  %p745_p0 = scmp.ge.s32.totalorder %s1031_s24, 1  ;;  %s1031_s24 = sphi %s1080_s24, %s19_s24  }
   0x3   : > { %p202_p1 = scmp.lt.s32.totalorder %s1031_s24, 3  ;;  %p894_p2 = scmp.eq.s32.totalorder %s1086_s25, 0 }
   0x4   : > { %s1033_s27 = smov [#allocation4]   ;;  %s1034_s29 = smov [#allocation2]  }
   0x5   : > { %p1091_p3 = pnand %p745_p0, %p202_p1  ;;  %s230_s28 = sshll.u32 %s1033_s27, 4  ;;  %s231_s28 = int_to_ptr.vmem [resolvable:$true] %s230_s28 }
   0x6   : > { %s214_s30 = sshll.u32 %s1034_s29, 4  ;;  %s1035_s9 = smov [#allocation6]   ;;  %s215_s30 = int_to_ptr.vmem [resolvable:$true] %s214_s30 }
   0x7   : > { %p884_p4 = pneg %p1091_p3  ;;  %s246_s10 = sshll.u32 %s1035_s9, 4  ;;  %s1103_s10 = int_to_ptr.vmem [resolvable:$true] %s246_s10 }
   0x8   : > { %s950_s11 = scalar_lea.vmem %s231_s28, 1024  ;;  %p958_p10 = scmp.lt.s32.totalorder %s231_s28, %s231_s28 }
   0x9   : > { %p1099_p5 = pnand %p894_p2, %p884_p4  ;;  %p951_p7 = scmp.ne.s32.totalorder %s231_s28, %s950_s11 }
   0xa   : > { %p959_p11 = scmp.lt.s32.totalorder %s950_s11, %s950_s11 }
   0xb   : > { %p941_p6 = pneg %p1099_p5 }
   0xc   : > { %p960_p12 = por %p959_p11, %p958_p10 }
   0xd   : > { %p953_p8 = pnand %p951_p7, %p941_p6 }
   0xf   : > { %p954_p9 = pneg %p953_p8 }
  0x11   : > { %p961_p13 = pnand %p960_p12, %p954_p9 }
  0x13   : > { %964 = shalt.err (!%p961_p13)
}
  0x14   : > { %s1036_s12 = smov 64   ;;  %s1037_s13 = smov 4  }
  0x15   : > { %890 = dma.hbm_to_vmem [thread:$0]  (!%p1099_p5), %s1206_s3, 1024, %s231_s28, [#allocation5], %s1036_s12, %s1036_s12, %s1037_s13  }
  0x16   : > { %s976_s16 = scalar_lea.vmem %s215_s30, 1024  ;;  %p984_p7 = scmp.lt.s32.totalorder %s215_s30, %s215_s30 }
  0x17   : > { %p977_p0 = scmp.ne.s32.totalorder %s215_s30, %s976_s16  ;;  %p985_p8 = scmp.lt.s32.totalorder %s976_s16, %s976_s16 }
  0x19   : > { %p979_p1 = pnand %p977_p0, %p941_p6  ;;  %p986_p10 = por %p985_p8, %p984_p7 }
  0x1b   : > { %p980_p4 = pneg %p979_p1 }
  0x1d   : > { %p987_p9 = pnand %p986_p10, %p980_p4 }
  0x1f   : > { %990 = shalt.err (!%p987_p9)
}
  0x20   : > { %887 = dma.hbm_to_vmem [thread:$0]  (!%p1099_p5), %s1204_s1, 1024, %s215_s30, [#allocation3], %s1036_s12, %s1036_s12, %s1037_s13  }
  0x21   : > { %s1002_s19 = scalar_lea.vmem %s1103_s10, 1024  ;;  %p1010_p0 = scmp.lt.s32.totalorder %s1103_s10, %s1103_s10 }
  0x22   : > { %p1003_p11 = scmp.ne.s32.totalorder %s1103_s10, %s1002_s19  ;;  %p1011_p1 = scmp.lt.s32.totalorder %s1002_s19, %s1002_s19 }
  0x24   : > { %p1005_p12 = pnand %p1003_p11, %p941_p6  ;;  %p1012_p4 = por %p1011_p1, %p1010_p0 }
  0x26   : > { %p1006_p13 = pneg %p1005_p12 }
  0x28   : > { %p1013_p7 = pnand %p1012_p4, %p1006_p13 }
  0x2a   : > { %1016 = shalt.err (!%p1013_p7)
}
  0x2b   : > { %893 = dma.hbm_to_vmem [thread:$0]  (!%p1099_p5), %s1208_s5, 1024, %s1103_s10, [#allocation5], %s1036_s12, %s1036_s12, %s1037_s13  }
  0x2c   : > { %272 = sbr.rel (%p1091_p3) target bundleno = 683 (0x2ab), region = 48 }
  0x31   : > { %1022 = dma.done.wait (%p894_p2), [#allocation3], 1024  }
  0x32   : > { %1024 = vsyncadd (%p894_p2), [#allocation3], 4294966272 }
  0x33   : > { %1026 = dma.done.wait (%p894_p2), [#allocation5], 2048  }
  0x34   : > { %1028 = vsyncadd (%p894_p2), [#allocation5], 4294965248  ;;  %v1038_v0 = vmov 0.0   ;;  %vm1039_vm0 = vmmov 0   ;;  %v915_v1 = vld [vmem:[#allocation2 + $0x38] sm:$0xff]   ;;  %v916_v2 = vld [vmem:[#allocation2 + $0x30] sm:$0xff]  }
  0x35   : > { %812 = vmatprep.subr.bf16.mxu0 %v1038_v0  ;;  %828 = vmatprep.mubr.msk.bf16.mxu0 %vm1039_vm0, %v1038_v0  ;;  %v917_v3 = vld [vmem:[#allocation2 + $0x28] sm:$0xff]   ;;  %p310_p2 = scmp.lt.s32.totalorder %s1086_s25, 1  ;;  %v923_v4 = vld [vmem:[#allocation4 + $0x38] sm:$0xff]   ;;  %v918_v5 = vld [vmem:[#allocation2 + $0x20] sm:$0xff]  }
  0x36   : > { %832 = vmatprep.subr.bf16.mxu1 %v1038_v0  ;;  %848 = vmatprep.mubr.msk.bf16.mxu1 %vm1039_vm0, %v1038_v0  ;;  %v924_v6 = vld [vmem:[#allocation4 + $0x30] sm:$0xff]   ;;  %v919_v7 = vld [vmem:[#allocation2 + $0x18] sm:$0xff]   ;;  %v925_v8 = vld [vmem:[#allocation4 + $0x28] sm:$0xff]  }
  0x37   : > { %813 = vmatpush3.bf16.msra.mxu0 %v915_v1  ;;  %s1214_s25 = smov (!%p310_p2, %s1086_s25), 1  ;;  %833 = vmatpush3.bf16.msra.mxu1 %v923_v4  ;;  %v920_v9 = vld [vmem:[#allocation2 + $0x10] sm:$0xff]   ;;  %v926_v10 = vld [vmem:[#allocation4 + $0x20] sm:$0xff]   ;;  %v921_v11 = vld [vmem:[#allocation2 + $0x8] sm:$0xff]  }
  0x38   : > { %814 = vmatprep.subr.bf16.mxu0 %v1038_v0  ;;  %834 = vmatprep.subr.bf16.mxu1 %v1038_v0  ;;  %s754_s22 = sshll.u32 %s1214_s25, 3  ;;  %v927_v12 = vld [vmem:[#allocation4 + $0x18] sm:$0xff]   ;;  %v922_v13 = vld [vmem:[#allocation2] sm:$0xff]   ;;  %v928_v15 = vld [vmem:[#allocation4 + $0x10] sm:$0xff]  }
  0x39   : > { %s313_s27 = scalar_lea.vmem %s1203_s0, %s754_s22  ;;  %v929_v17 = vld [vmem:[#allocation4 + $0x8] sm:$0xff]   ;;  %v930_v18 = vld [vmem:[#allocation4] sm:$0xff]   ;;  %v931_v19 = vld [vmem:[#allocation6 + $0x38] sm:$0xff]   ;;  %s317_s13 = scalar_lea.vmem %s1210_s7, %s754_s22 }
  0x3a   : > { %v319_v14 = vld [vmem:[%s313_s27] sm:$0xff]  ;;  %v932_v20 = vld [vmem:[#allocation6 + $0x30] sm:$0xff]   ;;  %v933_v21 = vld [vmem:[#allocation6 + $0x28] sm:$0xff]  }
  0x3b   : > { %815 = vmatpush3.bf16.msra.mxu0 %v916_v2  ;;  %835 = vmatpush3.bf16.msra.mxu1 %v924_v6  ;;  %v337_v16 = vpack.c.bf16 %v319_v14, %v319_v14  ;;  %v934_v22 = vld [vmem:[#allocation6 + $0x20] sm:$0xff]   ;;  %v935_v23 = vld [vmem:[#allocation6 + $0x18] sm:$0xff]   ;;  %v936_v24 = vld [vmem:[#allocation6 + $0x10] sm:$0xff]  }
  0x3c   : > { %816 = vmatprep.subr.bf16.mxu0 %v1038_v0  ;;  %836 = vmatprep.subr.bf16.mxu1 %v1038_v0  ;;  %v756_v25 = vld [vmem:[%s1205_s2] ss:$0 sm:$0xff]  ;;  %v937_v33 = vld [vmem:[#allocation6 + $0x8] sm:$0xff]  }
  0x3d   : > { %v938_v34 = vld [vmem:[#allocation6] sm:$0xff]  }
  0x3e   : > { %v765_v35 = vld [vmem:[%s1207_s4] ss:$0 sm:$0xff] }
  0x3f   : > { %817 = vmatpush3.bf16.msra.mxu0 %v917_v3  ;;  %837 = vmatpush3.bf16.msra.mxu1 %v925_v8  ;;  %v774_v43 = vld [vmem:[%s1209_s6] ss:$0 sm:$0xff] }
  0x40   : > { %818 = vmatprep.subr.bf16.mxu0 %v1038_v0  ;;  %838 = vmatprep.subr.bf16.mxu1 %v1038_v0 }
  0x43   : > { %819 = vmatpush3.bf16.msra.mxu0 %v918_v5  ;;  %839 = vmatpush3.bf16.msra.mxu1 %v926_v10 }
  0x44   : > { %820 = vmatprep.subr.bf16.mxu0 %v1038_v0  ;;  %840 = vmatprep.subr.bf16.mxu1 %v1038_v0 }
  0x47   : > { %821 = vmatpush3.bf16.msra.mxu0 %v919_v7  ;;  %841 = vmatpush3.bf16.msra.mxu1 %v927_v12 }
  0x48   : > { %822 = vmatprep.subr.bf16.mxu0 %v1038_v0  ;;  %842 = vmatprep.subr.bf16.mxu1 %v1038_v0 }
  0x4b   : > { %823 = vmatpush3.bf16.msra.mxu0 %v920_v9  ;;  %843 = vmatpush3.bf16.msra.mxu1 %v928_v15 }
  0x4c   : > { %824 = vmatprep.subr.bf16.mxu0 %v1038_v0  ;;  %844 = vmatprep.subr.bf16.mxu1 %v1038_v0 }
  0x4f   : > { %825 = vmatpush3.bf16.msra.mxu0 %v921_v11  ;;  %845 = vmatpush3.bf16.msra.mxu1 %v929_v17 }
  0x50   : > { %826 = vmatprep.subr.bf16.mxu0 %v1038_v0  ;;  %846 = vmatprep.subr.bf16.mxu1 %v1038_v0 }
  0x53   : > { %827 = vmatpush3.bf16.msra.mxu0 %v922_v13  ;;  %847 = vmatpush3.bf16.msra.mxu1 %v930_v18 }
  0x54   : > { %852 = vmatprep.subr.bf16.mxu0 %v1038_v0 }
  0x56   : > { %829 = vmatmul.mubr.bf16.vlgmr.msra.gmra.mxu0 %v337_v16 }
  0x57   : > { %868 = vmatprep.mubr.msk.bf16.mxu0 %vm1039_vm0, %v1038_v0  ;;  %853 = vmatpush3.bf16.msra.mxu0 %v931_v19 }
  0x58   : > { %854 = vmatprep.subr.bf16.mxu0 %v1038_v0 }
  0x5b   : > { %855 = vmatpush3.bf16.msra.mxu0 %v932_v20 }
  0x5c   : > { %856 = vmatprep.subr.bf16.mxu0 %v1038_v0 }
  0x5f   : > { %857 = vmatpush3.bf16.msra.mxu0 %v933_v21 }
  0x60   : > { %858 = vmatprep.subr.bf16.mxu0 %v1038_v0 }
  0x63   : > { %859 = vmatpush3.bf16.msra.mxu0 %v934_v22 }
  0x64   : > { %860 = vmatprep.subr.bf16.mxu0 %v1038_v0 }
  0x67   : > { %861 = vmatpush3.bf16.msra.mxu0 %v935_v23 }
  0x68   : > { %862 = vmatprep.subr.bf16.mxu0 %v1038_v0 }
  0x6b   : > { %863 = vmatpush3.bf16.msra.mxu0 %v936_v24 }
  0x6c   : > { %864 = vmatprep.subr.bf16.mxu0 %v1038_v0 }
  0x6f   : > { %865 = vmatpush3.bf16.msra.mxu0 %v937_v33 }
  0x70   : > { %866 = vmatprep.subr.bf16.mxu0 %v1038_v0 }
  0x73   : > { %867 = vmatpush3.bf16.msra.mxu0 %v938_v34 }
 0x116   : > { %v426_v26 = vpop.f32.mrf.mxu0 }
 0x117   : > { %v427_v27 = vadd.f32 %v756_v25, %v426_v26 }
 0x118   : > { %v830_v28 = vpop.f32.mrf.mxu0 }
 0x119   : > { %v432_v29 = vmax.f32 %v427_v27, 0.0 }
 0x11a   : > { %v429_v30 = vpop.f32.mrf.mxu0 }
 0x11b   : > { %v450_v31 = vpack.c.bf16 %v432_v29, %v432_v29 }
 0x11c   : > { %v831_v32 = vpop.f32.mrf.mxu0 }
 0x11d   : > { %849 = vmatmul.mubr.bf16.vlgmr.msra.gmra.mxu1 %v450_v31 }
 0x1dd   : > { %v539_v36 = vpop.f32.mrf.mxu1 }
 0x1de   : > { %v540_v37 = vadd.f32 %v765_v35, %v539_v36 }
 0x1df   : > { %v850_v38 = vpop.f32.mrf.mxu1 }
 0x1e0   : > { %v545_v39 = vmax.f32 %v540_v37, 0.0 }
 0x1e1   : > { %v542_v40 = vpop.f32.mrf.mxu1 }
 0x1e2   : > { %v563_v41 = vpack.c.bf16 %v545_v39, %v545_v39 }
 0x1e3   : > { %v851_v42 = vpop.f32.mrf.mxu1 }
 0x1e4   : > { %869 = vmatmul.mubr.bf16.vlgmr.msra.gmra.mxu0 %v563_v41 }
 0x2a4   : > { %v652_v44 = vpop.f32.mrf.mxu0 }
 0x2a5   : > { %v653_v45 = vadd.f32 %v774_v43, %v652_v44 }
 0x2a6   : > { %v870_v46 = vpop.f32.mrf.mxu0 }
 0x2a7   : > { %658 = vst [vmem:[%s317_s13] sm:$0xff] %v653_v45 }
 0x2a8   : > { %v655_v47 = vpop.f32.mrf.mxu0 }
 0x2aa   : > { %v871_v48 = vpop.f32.mrf.mxu0 }
 0x2ab PF: > { %s19_s24 = sadd.s32 1, %s1031_s24  }
 0x2ac   : > { %p16_p3 = scmp.ge.s32.totalorder %s19_s24, 4  }
 0x2ae   :  { %18 = sbr.rel (!%p16_p3) target bundleno = 2 (0x2), region = 91 }
 0x2b3   :  { %678 = vsyncpa [#allocation3], 1 }
 0x2b4   :  { %680 = vsyncpa [#allocation3 + $0x1], 1 }
 0x2b5   :  { %681 = vsyncpa [#allocation5], 1 }

</bundles_post_ra>
